<compile_context>
chip_gen: v7x
topology: tpu7x:2x2x1
jax: 0.10.0
libtpu: 0.0.40
codegen_flags: <defaults>
</compile_context>

<pallas_src>
import jax
import jax.numpy as jnp
from jax.experimental import pallas as pl
from jax.experimental.pallas import tpu as pltpu


def _round_up(n, m):
    return ((n + m - 1) // m) * m


def _mlp_kernel(xt_ref, w1_ref, b1_ref, w2_ref, b2_ref,
                w3_ref, b3_ref, w4_ref, b4_ref, o_ref):
    """Batch-on-lanes MLP: every operand / intermediate is (features, TB)."""
    md = w1_ref.dtype  # MXU operand dtype (bf16 fast path / f32 exact path)

    # fc1 + ReLU : (32,48) @ (48,TB) -> (32,TB)
    h = jnp.dot(w1_ref[...], xt_ref[...], preferred_element_type=jnp.float32)
    h = jnp.maximum(h + b1_ref[...], 0.0)
    # fc2 + ReLU : (32,32) @ (32,TB) -> (32,TB)
    h = jnp.dot(w2_ref[...], h.astype(md), preferred_element_type=jnp.float32)
    h = jnp.maximum(h + b2_ref[...], 0.0)
    # fc3 + ReLU : (16,32) @ (32,TB) -> (16,TB)
    h = jnp.dot(w3_ref[...], h.astype(md), preferred_element_type=jnp.float32)
    h = jnp.maximum(h + b3_ref[...], 0.0)
    # fc4 : (8,16) @ (16,TB) -> (8,TB); only row 0 is real
    logits = jnp.dot(w4_ref[...], h.astype(md),
                     preferred_element_type=jnp.float32) + b4_ref[...]
    row = jnp.maximum(logits[0:1, :], 0.0)        # ReLU after fc4 (as in the module)
    # Sigmoid; reciprocal goes to the otherwise-idle EUP slot.
    o_ref[...] = pl.reciprocal(1.0 + jnp.exp(-row), approx=True).astype(o_ref.dtype)


def nn_classifier_forward(x, params, *, tb=4096, matmul_dtype=jnp.bfloat16):
    """Fused 4-layer MLP + sigmoid.

    params: [(w, b), ...] with w of shape (in, out) (transpose of torch's (out, in))
    and b of shape (1, out), all float32.
    """
    (w1, b1), (w2, b2), (w3, b3), (w4, b4) = params
    B, d_in = x.shape

    # Padded feature dims: multiples of 16 for contraction dims (good for f32
    # sublane=8 and bf16 sublane-packing=16); fc4 output padded to 8 sublanes only.
    dims = [d_in, w1.shape[1], w2.shape[1], w3.shape[1], w4.shape[1]]  # 42,30,20,10,1
    pdims = [_round_up(d, 16) for d in dims[:-1]] + [8]                # 48,32,32,16,8

    # Pre-transpose, pad and cast the weights once; biases stay f32, shape (out,1)
    # so they lane-broadcast over the batch.
    prepped = []
    for li, (w, b) in enumerate(((w1, b1), (w2, b2), (w3, b3), (w4, b4))):
        pin, pout = pdims[li], pdims[li + 1]
        wt = jnp.zeros((pout, pin), matmul_dtype)
        wt = wt.at[: w.shape[1], : w.shape[0]].set(jnp.transpose(w).astype(matmul_dtype))
        bt = jnp.zeros((pout, 1), jnp.float32)
        bt = bt.at[: b.shape[1], :].set(jnp.transpose(b).astype(jnp.float32))
        prepped.append((wt, bt))

    # Batch tiling: TB is the lane dim everywhere -> multiple of 128.  Large tiles
    # amortize the ~0.35us grid-step overhead; keep >= 2 steps when the batch
    # allows so v7x's two TensorCores both get work (batch axis is "parallel").
    b128 = _round_up(B, 128)
    tb = max(128, min(_round_up(int(tb), 128), b128))
    n_steps = -(-b128 // tb)
    if n_steps == 1 and b128 >= 256:
        n_steps = 2
    tb = _round_up(-(-b128 // n_steps), 128)
    b_pad = n_steps * tb

    # x^T, padded and cast to the MXU dtype in the wrapper (pad+cast+transpose fuse
    # into one XLA pass over x; halves x's HBM traffic when matmul_dtype=bf16).
    x_t = jnp.zeros((pdims[0], b_pad), matmul_dtype)
    x_t = x_t.at[:d_in, :B].set(jnp.transpose(x).astype(matmul_dtype))

    def resident(a):
        # Whole-array block, constant index_map -> stays in VMEM across grid steps.
        return pl.BlockSpec(a.shape, lambda i: (0, 0))

    in_specs = [pl.BlockSpec((pdims[0], tb), lambda i: (0, i))]
    flat_params = []
    for wt, bt in prepped:
        in_specs += [resident(wt), resident(bt)]
        flat_params += [wt, bt]

    out2d = pl.pallas_call(
        _mlp_kernel,
        out_shape=jax.ShapeDtypeStruct((1, b_pad), jnp.float32),
        grid=(n_steps,),
        in_specs=in_specs,
        out_specs=pl.BlockSpec((1, tb), lambda i: (0, i)),
        compiler_params=pltpu.CompilerParams(
            dimension_semantics=("parallel",),  # shard batch tiles across TCs on v7x
        ),
    )(x_t, *flat_params)

    return out2d[0, :B].reshape(B, 1)


def init_params(key):
    """Deterministic init matching nn.Linear shapes (weights stored as (in, out))."""
    dims = [(42, 30), (30, 20), (20, 10), (10, 1)]
    params = []
    for (d_in, d_out) in dims:
        key, kw, kb = jax.random.split(key, 3)
        bound = 1.0 / jnp.sqrt(d_in)
        w = jax.random.uniform(kw, (d_in, d_out), jnp.float32, -bound, bound)
        b = jax.random.uniform(kb, (1, d_out), jnp.float32, -bound, bound)
        params.append((w, b))
    return params


def reference_forward(x, params, dot_dtype=jnp.float32):
    """Pure-JAX reference. dot_dtype=bf16 emulates the kernel's MXU operand dtype
    (bf16 inputs, exact f32 accumulation) for a tight structural check."""
    h = x
    for (w, b) in params:
        h = jnp.dot(h.astype(dot_dtype), w.astype(dot_dtype),
                    preferred_element_type=jnp.float32,
                    precision=jax.lax.Precision.HIGHEST) + b
        h = jnp.maximum(h, 0.0)          # ReLU after every layer, incl. fc4
    return 1.0 / (1.0 + jnp.exp(-h))     # sigmoid


if __name__ == "__main__":
    key = jax.random.PRNGKey(0)
    key, kx = jax.random.split(key)
    B = 8
    x = jax.random.normal(kx, (B, 42), jnp.float32)
    params = init_params(key)

    out = nn_classifier_forward(x, params)          # default bf16 MXU / f32 accum
    out = jax.block_until_ready(out)
    assert out.shape == (B, 1), out.shape

    # Structural check against a bf16-operand / f32-accum reference.
    # (tolerance covers the EUP approximate reciprocal in the sigmoid)
    ref_bf16 = reference_forward(x, params, dot_dtype=jnp.bfloat16)
    assert jnp.allclose(out, ref_bf16, atol=5e-3, rtol=0.0), (out, ref_bf16)

    # Loose accuracy check against the full-precision model.
    ref_f32 = reference_forward(x, params, dot_dtype=jnp.float32)
    assert jnp.allclose(out, ref_f32, atol=3e-2, rtol=0.0), (out, ref_f32)

    # Exact-path check (f32 matmuls end to end).
    out_f32 = jax.block_until_ready(
        nn_classifier_forward(x, params, matmul_dtype=jnp.float32))
    assert jnp.allclose(out_f32, ref_f32, atol=5e-3, rtol=0.0), (out_f32, ref_f32)

    print("KERNEL_OK")
</pallas_src>

<mosaic_0001>
module attributes {stable_mosaic.version = 11 : i64} {
  func.func @_mlp_kernel(%arg0: i32, %arg1: memref<48x128xbf16, #tpu.memory_space<vmem>>, %arg2: memref<32x48xbf16, #tpu.memory_space<vmem>>, %arg3: memref<32x1xf32, #tpu.memory_space<vmem>>, %arg4: memref<32x32xbf16, #tpu.memory_space<vmem>>, %arg5: memref<32x1xf32, #tpu.memory_space<vmem>>, %arg6: memref<16x32xbf16, #tpu.memory_space<vmem>>, %arg7: memref<16x1xf32, #tpu.memory_space<vmem>>, %arg8: memref<8x16xbf16, #tpu.memory_space<vmem>>, %arg9: memref<8x1xf32, #tpu.memory_space<vmem>>, %arg10: memref<1x128xf32, #tpu.memory_space<vmem>>) attributes {dimension_semantics = [#tpu.dimension_semantics<parallel>], iteration_bounds = array<i64: 1>, scalar_prefetch = 0 : i64, scratch_operands = 0 : i64, tpu.core_type = #tpu.core_type<tc>, window_params = [{transform_indices = @transform_0, window_bounds = array<i64: 48, 128>}, {pipeline_mode = #tpu.pipeline_mode<synchronous>, transform_indices = @transform_1, window_bounds = array<i64: 32, 48>}, {pipeline_mode = #tpu.pipeline_mode<synchronous>, transform_indices = @transform_2, window_bounds = array<i64: 32, 1>}, {pipeline_mode = #tpu.pipeline_mode<synchronous>, transform_indices = @transform_3, window_bounds = array<i64: 32, 32>}, {pipeline_mode = #tpu.pipeline_mode<synchronous>, transform_indices = @transform_4, window_bounds = array<i64: 32, 1>}, {pipeline_mode = #tpu.pipeline_mode<synchronous>, transform_indices = @transform_5, window_bounds = array<i64: 16, 32>}, {pipeline_mode = #tpu.pipeline_mode<synchronous>, transform_indices = @transform_6, window_bounds = array<i64: 16, 1>}, {pipeline_mode = #tpu.pipeline_mode<synchronous>, transform_indices = @transform_7, window_bounds = array<i64: 8, 16>}, {pipeline_mode = #tpu.pipeline_mode<synchronous>, transform_indices = @transform_8, window_bounds = array<i64: 8, 1>}, {transform_indices = @transform_9, window_bounds = array<i64: 1, 128>}]} {
    %c0 = arith.constant 0 : index
    %c0_0 = arith.constant 0 : index
    %0 = vector.load %arg2[%c0, %c0_0] : memref<32x48xbf16, #tpu.memory_space<vmem>>, vector<32x48xbf16>
    %c0_1 = arith.constant 0 : index
    %c0_2 = arith.constant 0 : index
    %1 = vector.load %arg1[%c0_1, %c0_2] : memref<48x128xbf16, #tpu.memory_space<vmem>>, vector<48x128xbf16>
    %cst = arith.constant dense<0.000000e+00> : vector<32x128xf32>
    %2 = tpu.matmul %0, %1, %cst {dimension_numbers = #tpu.dot_dimension_numbers<[1], [0], [0], [1], [0, 0, 1, 1], [], []>} : vector<32x48xbf16>, vector<48x128xbf16>, vector<32x128xf32> -> vector<32x128xf32>
    %c0_3 = arith.constant 0 : index
    %c0_4 = arith.constant 0 : index
    %3 = vector.load %arg3[%c0_3, %c0_4] : memref<32x1xf32, #tpu.memory_space<vmem>>, vector<32x1xf32>
    %4 = vector.broadcast %3 : vector<32x1xf32> to vector<32x128xf32>
    %5 = arith.addf %2, %4 : vector<32x128xf32>
    %cst_5 = arith.constant 0.000000e+00 : f32
    %6 = vector.broadcast %cst_5 : f32 to vector<32x128xf32>
    %7 = arith.maximumf %5, %6 : vector<32x128xf32>
    %c0_6 = arith.constant 0 : index
    %c0_7 = arith.constant 0 : index
    %8 = vector.load %arg4[%c0_6, %c0_7] : memref<32x32xbf16, #tpu.memory_space<vmem>>, vector<32x32xbf16>
    %9 = arith.truncf %7 : vector<32x128xf32> to vector<32x128xbf16>
    %cst_8 = arith.constant dense<0.000000e+00> : vector<32x128xf32>
    %10 = tpu.matmul %8, %9, %cst_8 {dimension_numbers = #tpu.dot_dimension_numbers<[1], [0], [0], [1], [0, 0, 1, 1], [], []>} : vector<32x32xbf16>, vector<32x128xbf16>, vector<32x128xf32> -> vector<32x128xf32>
    %c0_9 = arith.constant 0 : index
    %c0_10 = arith.constant 0 : index
    %11 = vector.load %arg5[%c0_9, %c0_10] : memref<32x1xf32, #tpu.memory_space<vmem>>, vector<32x1xf32>
    %12 = vector.broadcast %11 : vector<32x1xf32> to vector<32x128xf32>
    %13 = arith.addf %10, %12 : vector<32x128xf32>
    %cst_11 = arith.constant 0.000000e+00 : f32
    %14 = vector.broadcast %cst_11 : f32 to vector<32x128xf32>
    %15 = arith.maximumf %13, %14 : vector<32x128xf32>
    %c0_12 = arith.constant 0 : index
    %c0_13 = arith.constant 0 : index
    %16 = vector.load %arg6[%c0_12, %c0_13] : memref<16x32xbf16, #tpu.memory_space<vmem>>, vector<16x32xbf16>
    %17 = arith.truncf %15 : vector<32x128xf32> to vector<32x128xbf16>
    %cst_14 = arith.constant dense<0.000000e+00> : vector<16x128xf32>
    %18 = tpu.matmul %16, %17, %cst_14 {dimension_numbers = #tpu.dot_dimension_numbers<[1], [0], [0], [1], [0, 0, 1, 1], [], []>} : vector<16x32xbf16>, vector<32x128xbf16>, vector<16x128xf32> -> vector<16x128xf32>
    %c0_15 = arith.constant 0 : index
    %c0_16 = arith.constant 0 : index
    %19 = vector.load %arg7[%c0_15, %c0_16] : memref<16x1xf32, #tpu.memory_space<vmem>>, vector<16x1xf32>
    %20 = vector.broadcast %19 : vector<16x1xf32> to vector<16x128xf32>
    %21 = arith.addf %18, %20 : vector<16x128xf32>
    %cst_17 = arith.constant 0.000000e+00 : f32
    %22 = vector.broadcast %cst_17 : f32 to vector<16x128xf32>
    %23 = arith.maximumf %21, %22 : vector<16x128xf32>
    %c0_18 = arith.constant 0 : index
    %c0_19 = arith.constant 0 : index
    %24 = vector.load %arg8[%c0_18, %c0_19] : memref<8x16xbf16, #tpu.memory_space<vmem>>, vector<8x16xbf16>
    %25 = arith.truncf %23 : vector<16x128xf32> to vector<16x128xbf16>
    %cst_20 = arith.constant dense<0.000000e+00> : vector<8x128xf32>
    %26 = tpu.matmul %24, %25, %cst_20 {dimension_numbers = #tpu.dot_dimension_numbers<[1], [0], [0], [1], [0, 0, 1, 1], [], []>} : vector<8x16xbf16>, vector<16x128xbf16>, vector<8x128xf32> -> vector<8x128xf32>
    %c0_21 = arith.constant 0 : index
    %c0_22 = arith.constant 0 : index
    %27 = vector.load %arg9[%c0_21, %c0_22] : memref<8x1xf32, #tpu.memory_space<vmem>>, vector<8x1xf32>
    %28 = vector.broadcast %27 : vector<8x1xf32> to vector<8x128xf32>
    %29 = arith.addf %26, %28 : vector<8x128xf32>
    %30 = vector.extract_strided_slice %29 {offsets = [0, 0], sizes = [1, 128], strides = [1, 1]} : vector<8x128xf32> to vector<1x128xf32>
    %cst_23 = arith.constant 0.000000e+00 : f32
    %31 = vector.broadcast %cst_23 : f32 to vector<1x128xf32>
    %32 = arith.maximumf %30, %31 : vector<1x128xf32>
    %cst_24 = arith.constant 0.000000e+00 : f32
    %33 = vector.broadcast %cst_24 : f32 to vector<1x128xf32>
    %34 = arith.subf %33, %32 : vector<1x128xf32>
    %35 = math.exp %34 : vector<1x128xf32>
    %cst_25 = arith.constant 1.000000e+00 : f32
    %36 = vector.broadcast %cst_25 : f32 to vector<1x128xf32>
    %37 = arith.addf %36, %35 : vector<1x128xf32>
    %38 = tpu.reciprocal %37 {approx = true} : vector<1x128xf32> -> vector<1x128xf32>
    %c0_26 = arith.constant 0 : index
    %c0_27 = arith.constant 0 : index
    %39 = vector.load %arg10[%c0_26, %c0_27] : memref<1x128xf32, #tpu.memory_space<vmem>>, vector<1x128xf32>
    tpu.vector_store %arg10[%c0_26, %c0_27], %38 {strides = array<i32>} : memref<1x128xf32, #tpu.memory_space<vmem>>, vector<1x128xf32>,
    return
  }
  func.func @transform_0(%arg0: i32) -> (i32, i32) {
    %c0_i32 = arith.constant 0 : i32
    %c0_i32_0 = arith.constant 0 : i32
    return %c0_i32, %arg0 : i32, i32
  }
  func.func @transform_1(%arg0: i32) -> (i32, i32) {
    %c0_i32 = arith.constant 0 : i32
    %c0_i32_0 = arith.constant 0 : i32
    %c0_i32_1 = arith.constant 0 : i32
    return %c0_i32, %c0_i32_0 : i32, i32
  }
  func.func @transform_2(%arg0: i32) -> (i32, i32) {
    %c0_i32 = arith.constant 0 : i32
    %c0_i32_0 = arith.constant 0 : i32
    %c0_i32_1 = arith.constant 0 : i32
    return %c0_i32, %c0_i32_0 : i32, i32
  }
  func.func @transform_3(%arg0: i32) -> (i32, i32) {
    %c0_i32 = arith.constant 0 : i32
    %c0_i32_0 = arith.constant 0 : i32
    %c0_i32_1 = arith.constant 0 : i32
    return %c0_i32, %c0_i32_0 : i32, i32
  }
  func.func @transform_4(%arg0: i32) -> (i32, i32) {
    %c0_i32 = arith.constant 0 : i32
    %c0_i32_0 = arith.constant 0 : i32
    %c0_i32_1 = arith.constant 0 : i32
    return %c0_i32, %c0_i32_0 : i32, i32
  }
  func.func @transform_5(%arg0: i32) -> (i32, i32) {
    %c0_i32 = arith.constant 0 : i32
    %c0_i32_0 = arith.constant 0 : i32
    %c0_i32_1 = arith.constant 0 : i32
    return %c0_i32, %c0_i32_0 : i32, i32
  }
  func.func @transform_6(%arg0: i32) -> (i32, i32) {
    %c0_i32 = arith.constant 0 : i32
    %c0_i32_0 = arith.constant 0 : i32
    %c0_i32_1 = arith.constant 0 : i32
    return %c0_i32, %c0_i32_0 : i32, i32
  }
  func.func @transform_7(%arg0: i32) -> (i32, i32) {
    %c0_i32 = arith.constant 0 : i32
    %c0_i32_0 = arith.constant 0 : i32
    %c0_i32_1 = arith.constant 0 : i32
    return %c0_i32, %c0_i32_0 : i32, i32
  }
  func.func @transform_8(%arg0: i32) -> (i32, i32) {
    %c0_i32 = arith.constant 0 : i32
    %c0_i32_0 = arith.constant 0 : i32
    %c0_i32_1 = arith.constant 0 : i32
    return %c0_i32, %c0_i32_0 : i32, i32
  }
  func.func @transform_9(%arg0: i32) -> (i32, i32) {
    %c0_i32 = arith.constant 0 : i32
    %c0_i32_0 = arith.constant 0 : i32
    return %c0_i32, %arg0 : i32, i32
  }
}

</mosaic_0001>

<bundles_post_ra>
// kernel: tpu_custom_call.1
= control target key start
LH: loop header
LB: loop body
LE: loop exit
PB: predicated region body
PF: predicated region fallthrough
CT: control target
= control target key end

     0   :  { %vm96_vm0 = vcmask 392192   ;;  %v498_v2 = vmov 0   ;;  %s629_s0 = inlined_call_operand.vmem [shape: bf16[48,128], index: 0, kind: input, shape index: {}]   ;;  %s630_s1 = inlined_call_operand.vmem [shape: bf16[32,48], index: 1, kind: input, shape index: {}]   ;;  %s631_s2 = inlined_call_operand.vmem [shape: f32[32,1], index: 2, kind: input, shape index: {}]   ;;  %s632_s3 = inlined_call_operand.vmem [shape: bf16[32,32], index: 3, kind: input, shape index: {}]   ;;  %s633_s4 = inlined_call_operand.vmem [shape: f32[32,1], index: 4, kind: input, shape index: {}]   ;;  %s634_s5 = inlined_call_operand.vmem [shape: bf16[16,32], index: 5, kind: input, shape index: {}]   ;;  %s635_s6 = inlined_call_operand.vmem [shape: f32[16,1], index: 6, kind: input, shape index: {}]   ;;  %s636_s7 = inlined_call_operand.vmem [shape: bf16[8,16], index: 7, kind: input, shape index: {}]   ;;  %s637_s8 = inlined_call_operand.vmem [shape: f32[8,1], index: 8, kind: input, shape index: {}]   ;;  %s638_s9 = inlined_call_operand.hbm [shape: f32[1,128], index: 9, kind: output, shape index: {}]  }
   0x1   :  { %v462_v0 = vld [vmem:[%s629_s0] sm:$0xff]   ;;  %v463_v1 = vld [vmem:[%s629_s0 + $0x8] sm:$0xff]   ;;  %460 = vset.pattern.permute.xlu0 %v498_v2  ;;  %461 = vset.pattern.permute.xlu1 %v498_v2  ;;  %v464_v4 = vld [vmem:[%s629_s0 + $0x10] sm:$0xff]  }
   0x2   :  { %424 = vmatprep.subr.bf16.mxu0 %v462_v0  ;;  %v465_v3 = vld [vmem:[%s630_s1] sm:$0xff]   ;;  %v46_v6 = vld [vmem:[%s631_s2 + $0x10] sm:$0xff]  ;;  %v45_v7 = vld [vmem:[%s631_s2 + $0x8] sm:$0xff] }
   0x3   :  { %425 = vmatpush3.bf16.msra.mxu0 %v462_v0  ;;  %430 = vmatprep.mubr.msk.bf16.mxu0 %vm96_vm0, %v465_v3  ;;  %v44_v5 = vld [vmem:[%s631_s2] sm:$0xff]  ;;  %v47_v8 = vld [vmem:[%s631_s2 + $0x18] sm:$0xff]  ;;  %v466_v9 = vld [vmem:[%s630_s1 + $0x8] sm:$0xff]  }
   0x4   :  { %426 = vmatprep.subr.bf16.mxu0 %v463_v1  ;;  %50 = vperm.xlu0 %460, %v44_v5  }
   0x5   :  { %60 = vperm.xlu1 %461, %v46_v6  }
   0x7   :  { %427 = vmatpush3.bf16.msra.mxu0 %v463_v1 }
   0x8   :  { %428 = vmatprep.subr.bf16.mxu0 %v464_v4  ;;  %55 = vperm.xlu0 %460, %v45_v7  }
   0x9   :  { %65 = vperm.xlu1 %461, %v47_v8  }
   0xa   :  { %14 = vsyncpa [#allocation3], 0  ;;  %v162_v10 = vld [vmem:[%s633_s4] sm:$0xff]  ;;  %v163_v11 = vld [vmem:[%s633_s4 + $0x8] sm:$0xff]  ;;  %vm196_vm1 = vcmask 261120   ;;  %v499_v37 = vmov 0.0  }
   0xb   :  { %429 = vmatpush3.bf16.msra.mxu0 %v464_v4  ;;  %v164_v12 = vld [vmem:[%s633_s4 + $0x10] sm:$0xff]  ;;  %v165_v13 = vld [vmem:[%s633_s4 + $0x18] sm:$0xff]  ;;  %v260_v14 = vld [vmem:[%s635_s6] sm:$0xff]  ;;  %vm500_vm2 = vmmov 0   ;;  %vm331_vm3 = vcmask 130048  }
   0xc   :  { %168 = vperm.xlu0 %460, %v162_v10   ;;  %v261_v15 = vld [vmem:[%s635_s6 + $0x8] sm:$0xff]  ;;  %v325_v16 = vld [vmem:[%s637_s8] sm:$0xff]  ;;  %450 = vmatprep.subr.bf16.mxu0 %v499_v37 }
   0xd   :  { %173 = vperm.xlu1 %461, %v163_v11   ;;  %v467_v17 = vld [vmem:[%s632_s3] sm:$0xff]   ;;  %v468_v36 = vld [vmem:[%s632_s3 + $0x8] sm:$0xff]  }
   0xe   :  { %431 = vmatmul.mubr.msk.bf16.vlgmr.msra.gmra.mrb[0].mxu0 %vm96_vm0, %v466_v9  ;;  %438 = vmatprep.mubr.msk.bf16.mxu1 %vm196_vm1, %v467_v17  ;;  %v469_v56 = vld [vmem:[%s634_s5] sm:$0xff]   ;;  %s501_s5 = smov [#allocation2]  }
   0xf   :  { %452 = vmatprep.mubr.msk.bf16.mxu0 %vm500_vm2, %v499_v37  ;;  %v323_v4 = vld [vmem:[%s636_s7] sm:$0xf]  ;;  %s388_s21 = sshll.u32 %s501_s5, 4  ;;  %s389_s21 = int_to_ptr.vmem [resolvable:$true] %s388_s21 }
  0x10   :  { %178 = vperm.xlu0 %460, %v164_v12   ;;  %s474_s7 = scalar_lea.vmem %s389_s21, 16  ;;  %s478_s22 = scalar_lea.vmem %s389_s21, 32 }
  0x11   :  { %183 = vperm.xlu1 %461, %v165_v13   ;;  %p475_p0 = scmp.ne.s32.totalorder %s389_s21, %s474_s7  ;;  %p479_p1 = scmp.lt.s32.totalorder %s389_s21, %s389_s21 }
  0x12   :  { %p480_p2 = scmp.lt.s32.totalorder %s478_s22, %s474_s7 }
  0x14   :  { %264 = vperm.xlu0 %460, %v260_v14   ;;  %p481_p3 = por %p480_p2, %p479_p1 }
  0x15   :  { %269 = vperm.xlu1 %461, %v261_v15  }
  0x16   :  { %p482_p4 = pnand %p481_p3, %p475_p0 }
  0x18   :  { %328 = vperm.xlu0 %460, %v325_v16  }
  0x83   :  { %v51_v19 = vpop.permute.xlu0 %50 }
  0x84   :  { %v61_v18 = vpop.permute.xlu1 %60 }
  0x87   :  { %v56_v26 = vpop.permute.xlu0 %55 }
  0x88   :  { %v66_v23 = vpop.permute.xlu1 %65 }
  0x8b   :  { %v169_v38 = vpop.permute.xlu0 %168 }
  0x8c   :  { %v174_v39 = vpop.permute.xlu1 %173 }
  0x8f   :  { %v179_v40 = vpop.permute.xlu0 %178 }
  0x90   :  { %v184_v44 = vpop.permute.xlu1 %183 }
  0x93   :  { %v265_v57 = vpop.permute.xlu0 %264 }
  0x94   :  { %v270_v61 = vpop.permute.xlu1 %269 }
  0x97   :  { %v329_v5 = vpop.permute.xlu0 %328 }
  0xe1   :  { %v432_v20 = vpop.f32.mrb[0].mxu0 }
  0xe2   :  { %v146_v21 = vadd.f32 %v432_v20, %v61_v18  ;;  %v137_v22 = vpop.f32.mrb[1].mxu0 }
  0xe3   :  { %v138_v24 = vadd.f32 %v137_v22, %v51_v19  ;;  %v433_v25 = vpop.f32.mrb[2].mxu0 }
  0xe4   :  { %v149_v27 = vadd.f32 %v433_v25, %v66_v23  ;;  %v140_v28 = vpop.f32.mrb[3].mxu0  ;;  %v154_v30 = vmax.f32 %v146_v21, 0.0 }
  0xe5   :  { %v141_v29 = vadd.f32 %v140_v28, %v56_v26  ;;  %v152_v32 = vmax.f32 %v138_v24, 0.0 }
  0xe6   :  { %v155_v31 = vmax.f32 %v149_v27, 0.0 }
  0xe7   :  { %v153_v33 = vmax.f32 %v141_v29, 0.0 }
  0xe8   :  { %v161_v34 = vpack.c.bf16 %v155_v31, %v154_v30 }
  0xe9   :  { %v160_v35 = vpack.c.bf16 %v153_v33, %v152_v32 }
  0xeb   :  { %434 = vmatprep.subr.bf16.mxu1 %v160_v35 }
  0xec   :  { %435 = vmatpush3.bf16.msra.mxu1 %v160_v35 }
  0xed   :  { %436 = vmatprep.subr.bf16.mxu1 %v161_v34 }
  0xf0   :  { %437 = vmatpush3.bf16.msra.mxu1 %v161_v34 }
  0xf1   :  { %442 = vmatprep.subr.bf16.mxu1 %v499_v37 }
  0xf3   :  { %439 = vmatmul.mubr.msk.bf16.vlgmr.msra.gmra.mrb[0].mxu1 %vm196_vm1, %v468_v36 }
  0xf4   :  { %446 = vmatprep.mubr.msk.bf16.mxu1 %vm500_vm2, %v499_v37 }
 0x1c6   :  { %v440_v41 = vpop.f32.mrb[0].mxu1 }
 0x1c7   :  { %v246_v42 = vadd.f32 %v440_v41, %v179_v40  ;;  %v237_v43 = vpop.f32.mrb[1].mxu1 }
 0x1c8   :  { %v238_v45 = vadd.f32 %v237_v43, %v169_v38  ;;  %v441_v46 = vpop.f32.mrb[2].mxu1 }
 0x1c9   :  { %v249_v47 = vadd.f32 %v441_v46, %v184_v44  ;;  %v240_v48 = vpop.f32.mrb[3].mxu1  ;;  %v254_v50 = vmax.f32 %v246_v42, 0.0 }
 0x1ca   :  { %v241_v49 = vadd.f32 %v240_v48, %v174_v39  ;;  %v252_v52 = vmax.f32 %v238_v45, 0.0 }
 0x1cb   :  { %v255_v51 = vmax.f32 %v249_v47, 0.0 }
 0x1cc   :  { %v253_v53 = vmax.f32 %v241_v49, 0.0 }
 0x1cd   :  { %v259_v54 = vpack.c.bf16 %v255_v51, %v254_v50 }
 0x1ce   :  { %v258_v55 = vpack.c.bf16 %v253_v53, %v252_v52 }
 0x1d0   :  { %443 = vmatpush3.bf16.msra.mxu1 %v258_v55 }
 0x1d1   :  { %444 = vmatprep.subr.bf16.mxu1 %v499_v37 }
 0x1d4   :  { %445 = vmatpush3.bf16.msra.mxu1 %v259_v54 }
 0x1d7   :  { %447 = vmatmul.mubr.msk.bf16.vlgmr.msra.gmra.mrb[4].mxu1 %vm196_vm1, %v469_v56 }
 0x2aa   :  { %v314_v58 = vpop.f32.mrb[4].mxu1 }
 0x2ab   :  { %v315_v59 = vadd.f32 %v314_v58, %v265_v57  ;;  %v448_v60 = vpop.f32.mrb[5].mxu1 }
 0x2ac   :  { %v317_v62 = vpop.f32.mrb[6].mxu1 }
 0x2ad   :  { %v318_v63 = vadd.f32 %v317_v62, %v270_v61  ;;  %v449_v0 = vpop.f32.mrb[7].mxu1  ;;  %v321_v1 = vmax.f32 %v315_v59, 0.0 }
 0x2af   :  { %v322_v2 = vmax.f32 %v318_v63, 0.0 }
 0x2b1   :  { %v324_v3 = vpack.c.bf16 %v322_v2, %v321_v1 }
 0x2b3   :  { %451 = vmatpush3.bf16.msra.mxu0 %v324_v3 }
 0x2b6   :  { %453 = vmatmul.mubr.msk.bf16.vlgmr.msra.gmra.mrb[4].mxu0 %vm331_vm3, %v323_v4 }
 0x389   :  { %v369_v6 = vpop.f32.mrb[4].mxu0 }
 0x38a   :  { %v370_v7 = vadd.f32 %v369_v6, %v329_v5  ;;  %v454_v8 = vpop.f32.mrb[5].mxu0 }
 0x38b   :  { %v372_v9 = vpop.f32.mrb[6].mxu0 }
 0x38c   :  { %v375_v10 = vmax.f32 %v370_v7, 0.0  ;;  %v455_v11 = vpop.f32.mrb[7].mxu0 }
 0x38e   :  { %v376_v12 = vsub.f32 0.0, %v375_v10 }
 0x390   :  { %v377_v13 = vmul.f32 1.442695, %v376_v12 }
 0x392   :  { %470 = vpow2.f32 %v377_v13 }
 0x39c   :  { %v471_v14 = vpop.eup %470 }
 0x39d   :  { %v379_v15 = vadd.f32 1.0, %v471_v14 }
 0x39f   :  { %472 = vrcp.f32 %v379_v15 }
 0x3a9   :  { %v473_v16 = vpop.eup %472 }
 0x3aa   :  { %381 = vst [vmem:[#allocation2] sm:$0x1] %v473_v16 }
 0x3ab   :  { %485 = shalt.err (!%p482_p4)
}
 0x3ac   :  { %s486_s0 = scalar_lea.hbm %s638_s9, 16 }
 0x3ad   :  { %p487_p5 = scmp.ne.s32.totalorder %s638_s9, %s486_s0  ;;  %p490_p6 = scmp.lt.u32.totalorder %s486_s0, %s638_s9 }
 0x3af   :  { %p492_p7 = pnand %p490_p6, %p487_p5 }
 0x3b1   :  { %495 = shalt.err (!%p492_p7)
}
 0x3b2   :  { %391 = dma.vmem_to_hbm [thread:$0]  %s389_s21, 16, %s638_s9, [#allocation3]  }
 0x3b3   :  { %496 = dma.done.wait [#allocation3], 16  }
 0x3b4   :  { %497 = vsyncadd [#allocation3], 4294967280 }
 0x3b5   :  { %395 = vsyncpa [#allocation3], 1 }

</bundles_post_ra>
